<compile_context>
chip_gen: v6e
topology: v6e:2x2x1
jax: 0.10.0
libtpu: 0.0.40
codegen_flags: <defaults>
</compile_context>

<pallas_src>
import functools

import jax
import jax.numpy as jnp
from jax.experimental import pallas as pl
from jax.experimental.pallas import tpu as pltpu

_MIN_LANE = 128
_MIB = 1024 * 1024


def _tpu_params():
    """Return (target_tile_bytes_per_input, tensorcores_per_chip), safely."""
    target_bytes = 2 * _MIB
    cores = 1
    try:
        info = pltpu.get_tpu_info()
        vmem = int(getattr(info, "vmem_capacity_bytes", 128 * _MIB))
        if vmem <= 64 * _MIB:
            # v7x-class chip: bigger tiles amortize step overhead at 3.2 TB/s,
            # and there are 2 TensorCores per chip.
            target_bytes = 4 * _MIB
            cores = 2
        for name in ("tensor_cores_per_chip", "num_tensorcores",
                     "tensorcores_per_chip", "num_cores"):
            v = getattr(info, name, None)
            if isinstance(v, int) and 1 <= v <= 8:
                cores = v
                break
    except Exception:
        pass
    return target_bytes, cores


def _largest_divisor_multiple_of_8(m, hi, lo, quotient_multiple=1):
    """Largest d in [lo, hi] with d % 8 == 0, d | m, (m//d) % quotient_multiple == 0."""
    d = hi - (hi % 8)
    while d >= lo:
        if m % d == 0 and (m // d) % quotient_multiple == 0:
            return d
        d -= 8
    return None


def _diff_sum_kernel(a_ref, b_ref, o_ref, *, block_rows):
    t = pl.program_id(1)

    # First visit of this partition's resident output block: zero it.
    @pl.when(t == 0)
    def _():
        o_ref[...] = jnp.zeros_like(o_ref)

    # Upcast to f32 on the VPU; HBM traffic stays at native width.
    d = jnp.abs(a_ref[...].astype(jnp.float32) - b_ref[...].astype(jnp.float32))

    if block_rows % 8 == 0:
        # Per-vreg partial sums: (rows, lane) -> (rows//8, 8, lane) reduced over
        # the leading axis = pure VPU adds in the hot loop; the single
        # cross-lane reduce happens once in the wrapper.
        o_ref[0] += jnp.sum(d.reshape(-1, 8, d.shape[-1]), axis=0)
    else:
        # Single-block case (block_rows == full row count, not 8-aligned):
        # lane-preserving row sum, no in-kernel cross-lane reduce.
        o_ref[0, :1, :] += jnp.sum(d, axis=0, keepdims=True)


def diff2d(inputs1: jax.Array, inputs2: jax.Array) -> jax.Array:
    """Equivalent of torch.mean(torch.abs(inputs1 - inputs2))."""
    assert inputs1.shape == inputs2.shape, "shapes must match"
    n = int(inputs1.size)
    f32 = jnp.float32

    # Flatten (metadata-only for contiguous arrays); keep native dtype.
    flat1 = inputs1.reshape(-1)
    flat2 = inputs2.reshape(-1)

    # Lane alignment. Typical NCHW tensors have size % 128 == 0 -> no copy.
    # (Rare unaligned sizes pay a small pad copy; padded zeros contribute 0.)
    rem = n % _MIN_LANE
    if rem:
        pad = _MIN_LANE - rem
        flat1 = jnp.pad(flat1, (0, pad))
        flat2 = jnp.pad(flat2, (0, pad))
    n_al = int(flat1.shape[0])

    # Widest lane-dense layout that divides the element count.
    if n_al % 512 == 0:
        lane = 512
    elif n_al % 256 == 0:
        lane = 256
    else:
        lane = _MIN_LANE
    m = n_al // lane
    a2 = flat1.reshape(m, lane)
    b2 = flat2.reshape(m, lane)

    itemsize = jnp.dtype(inputs1.dtype).itemsize
    target_bytes, cores = _tpu_params()

    # --- Tile sizing (all Python ints, trace-time only) -------------------
    use_tail = False
    if m * lane * itemsize <= target_bytes:
        # Everything fits in one block (block first dim == full array dim, so
        # no multiple-of-8 requirement applies).
        block_rows = m
    else:
        rows_target = max(8, target_bytes // (lane * itemsize))
        hi = min(rows_target, m)
        lo = max(8, rows_target // 8)
        block_rows = None
        if cores >= 2:
            # Prefer an even block count so the 2-way TC split is balanced.
            block_rows = _largest_divisor_multiple_of_8(m, hi, lo, 2)
        if block_rows is None:
            block_rows = _largest_divisor_multiple_of_8(m, hi, lo, 1)
        if block_rows is None:
            # Degenerate row count: full near-target blocks in the kernel, the
            # few leftover rows reduced with plain jnp below.
            block_rows = max(8, hi - (hi % 8))
            use_tail = True

    num_blocks = m // block_rows
    num_parts = 2 if (cores >= 2 and num_blocks >= 2 and num_blocks % 2 == 0) else 1
    t_steps = num_blocks // num_parts
    rows_in_kernel = num_blocks * block_rows

    kernel = functools.partial(_diff_sum_kernel, block_rows=block_rows)
    in_map = lambda p, t: (p * t_steps + t, 0)

    partials = pl.pallas_call(
        kernel,
        out_shape=jax.ShapeDtypeStruct((num_parts, 8, lane), f32),
        grid=(num_parts, t_steps),
        in_specs=[
            pl.BlockSpec((block_rows, lane), in_map),
            pl.BlockSpec((block_rows, lane), in_map),
        ],
        # Per-partition resident output block (lane-dense), accumulated into
        # directly across the "arbitrary" reduction axis.
        out_specs=pl.BlockSpec((1, 8, lane), lambda p, t: (p, 0, 0)),
        compiler_params=pltpu.CompilerParams(
            dimension_semantics=("parallel", "arbitrary"),
            vmem_limit_bytes=32 * _MIB,
        ),
    )(a2, b2)

    total = jnp.sum(partials)

    # Rare fallback only (row count with no usable multiple-of-8 divisor):
    # reduce the few uncovered rows with plain jnp on a tiny tail slice.
    if use_tail and rows_in_kernel < m:
        tail_a = a2[rows_in_kernel:, :].astype(f32)
        tail_b = b2[rows_in_kernel:, :].astype(f32)
        total = total + jnp.sum(jnp.abs(tail_a - tail_b))

    # Mean over the ORIGINAL element count (padded zeros contribute 0).
    return total / f32(n)


if __name__ == "__main__":
    key = jax.random.PRNGKey(0)
    k1, k2, k3, k4 = jax.random.split(key, 4)

    # Small NCHW-shaped inputs (single-block path).
    x1 = jax.random.normal(k1, (2, 4, 16, 16), dtype=jnp.float32)
    x2 = jax.random.normal(k2, (2, 4, 16, 16), dtype=jnp.float32)
    out = jax.block_until_ready(diff2d(x1, x2))
    ref = jnp.mean(jnp.abs(x1 - x2))
    assert jnp.allclose(out, ref, rtol=1e-5, atol=1e-6), (out, ref)

    # Medium-sized check: exercises the exact-divisor multi-block tiling and
    # (on multi-TC chips) the balanced 2-way parallel partition.
    y1 = jax.random.normal(k3, (8, 8, 96, 96), dtype=jnp.float32)
    y2 = jax.random.normal(k4, (8, 8, 96, 96), dtype=jnp.float32)
    out2 = jax.block_until_ready(diff2d(y1, y2))
    ref2 = jnp.mean(jnp.abs(y1 - y2))
    assert jnp.allclose(out2, ref2, rtol=1e-4, atol=1e-6), (out2, ref2)

    # bf16 path: byte-based tile sizing with itemsize 2, in-kernel f32 upcast.
    z1 = jax.random.normal(k3, (4, 8, 64, 64), dtype=jnp.bfloat16)
    z2 = jax.random.normal(k4, (4, 8, 64, 64), dtype=jnp.bfloat16)
    out3 = jax.block_until_ready(diff2d(z1, z2))
    ref3 = jnp.mean(jnp.abs(z1.astype(jnp.float32) - z2.astype(jnp.float32)))
    assert jnp.allclose(out3, ref3, rtol=1e-3, atol=1e-5), (out3, ref3)

    print("KERNEL_OK")
</pallas_src>

<mosaic_0001>
module attributes {stable_mosaic.version = 11 : i64} {
  func.func @_diff_sum_kernel(%arg0: i32, %arg1: i32, %arg2: memref<4x512xf32, #tpu.memory_space<vmem>>, %arg3: memref<4x512xf32, #tpu.memory_space<vmem>>, %arg4: memref<1x8x512xf32, #tpu.memory_space<vmem>>) attributes {dimension_semantics = [#tpu.dimension_semantics<parallel>, #tpu.dimension_semantics<arbitrary>], iteration_bounds = array<i64: 1, 1>, scalar_prefetch = 0 : i64, scratch_operands = 0 : i64, tpu.core_type = #tpu.core_type<tc>, window_params = [{transform_indices = @transform_0, window_bounds = array<i64: 4, 512>}, {transform_indices = @transform_1, window_bounds = array<i64: 4, 512>}, {transform_indices = @transform_2, window_bounds = array<i64: 1, 8, 512>}]} {
    %c0_i32 = arith.constant 0 : i32
    %0 = arith.cmpi eq, %arg1, %c0_i32 : i32
    %1 = arith.extui %0 : i1 to i32
    %c0_i32_0 = arith.constant 0 : i32
    %2 = arith.cmpi ne, %1, %c0_i32_0 : i32
    scf.if %2 {
      %cst_10 = arith.constant 0.000000e+00 : f32
      %15 = vector.broadcast %cst_10 : f32 to vector<1x8x512xf32>
      %c0_11 = arith.constant 0 : index
      %c0_12 = arith.constant 0 : index
      %c0_13 = arith.constant 0 : index
      %16 = vector.load %arg4[%c0_11, %c0_12, %c0_13] : memref<1x8x512xf32, #tpu.memory_space<vmem>>, vector<1x8x512xf32>
      tpu.vector_store %arg4[%c0_11, %c0_12, %c0_13], %15 {strides = array<i32>} : memref<1x8x512xf32, #tpu.memory_space<vmem>>, vector<1x8x512xf32>,
    } else {
    }
    %c0 = arith.constant 0 : index
    %c0_1 = arith.constant 0 : index
    %3 = vector.load %arg2[%c0, %c0_1] : memref<4x512xf32, #tpu.memory_space<vmem>>, vector<4x512xf32>
    %c0_2 = arith.constant 0 : index
    %c0_3 = arith.constant 0 : index
    %4 = vector.load %arg3[%c0_2, %c0_3] : memref<4x512xf32, #tpu.memory_space<vmem>>, vector<4x512xf32>
    %5 = arith.subf %3, %4 : vector<4x512xf32>
    %6 = math.absf %5 : vector<4x512xf32>
    %c0_4 = arith.constant 0 : index
    %c0_5 = arith.constant 0 : index
    %c0_6 = arith.constant 0 : index
    %7 = vector.load %arg4[%c0_4, %c0_5, %c0_6] : memref<1x8x512xf32, #tpu.memory_space<vmem>>, vector<1x1x512xf32>
    %8 = vector.shape_cast %7 : vector<1x1x512xf32> to vector<1x512xf32>
    %cst = arith.constant dense<0.000000e+00> : vector<512xf32>
    %9 = vector.multi_reduction <add>, %6, %cst [0] : vector<4x512xf32> to vector<512xf32>
    %10 = vector.shape_cast %9 : vector<512xf32> to vector<1x512xf32>
    %11 = arith.addf %8, %10 : vector<1x512xf32>
    %c0_7 = arith.constant 0 : index
    %c0_8 = arith.constant 0 : index
    %c0_9 = arith.constant 0 : index
    %12 = vector.load %arg4[%c0_7, %c0_8, %c0_9] : memref<1x8x512xf32, #tpu.memory_space<vmem>>, vector<1x1x512xf32>
    %13 = vector.shape_cast %12 : vector<1x1x512xf32> to vector<1x512xf32>
    %14 = vector.shape_cast %11 : vector<1x512xf32> to vector<1x1x512xf32>
    tpu.vector_store %arg4[%c0_7, %c0_8, %c0_9], %14 {strides = array<i32>} : memref<1x8x512xf32, #tpu.memory_space<vmem>>, vector<1x1x512xf32>,
    return
  }
  func.func @transform_0(%arg0: i32, %arg1: i32) -> (i32, i32) {
    %c1_i32 = arith.constant 1 : i32
    %0 = arith.muli %arg0, %c1_i32 : i32
    %1 = arith.addi %0, %arg1 : i32
    %c0_i32 = arith.constant 0 : i32
    %c0_i32_0 = arith.constant 0 : i32
    return %1, %c0_i32 : i32, i32
  }
  func.func @transform_1(%arg0: i32, %arg1: i32) -> (i32, i32) {
    %c1_i32 = arith.constant 1 : i32
    %0 = arith.muli %arg0, %c1_i32 : i32
    %1 = arith.addi %0, %arg1 : i32
    %c0_i32 = arith.constant 0 : i32
    %c0_i32_0 = arith.constant 0 : i32
    return %1, %c0_i32 : i32, i32
  }
  func.func @transform_2(%arg0: i32, %arg1: i32) -> (i32, i32, i32) {
    %c0_i32 = arith.constant 0 : i32
    %c0_i32_0 = arith.constant 0 : i32
    %c0_i32_1 = arith.constant 0 : i32
    return %arg0, %c0_i32, %c0_i32_0 : i32, i32, i32
  }
}

</mosaic_0001>

<bundles_post_ra>
// kernel: tpu_custom_call.1
= control target key start
LH: loop header
LB: loop body
LE: loop exit
PB: predicated region body
PF: predicated region fallthrough
CT: control target
= control target key end

     0   :  { %7 = vsyncpa [#allocation3], 0  ;;  %s250_s0 = inlined_call_operand.hbm [shape: f32[4,512], index: 0, kind: input, shape index: {}]   ;;  %s251_s1 = inlined_call_operand.hbm [shape: f32[4,512], index: 1, kind: input, shape index: {}]   ;;  %s252_s2 = inlined_call_operand.hbm [shape: f32[1,8,512], index: 2, kind: output, shape index: {}]  }
   0x1   :  { %8 = vsyncpa [#allocation6], 0 }
   0x2   :  { %9 = vsyncpa [#allocation4], 0  ;;  %s221_s9 = smov [#allocation2]   ;;  %s222_s11 = smov [#allocation5]  }
   0x3   :  { %s20_s10 = sshll.u32 %s221_s9, 4  ;;  %s34_s12 = sshll.u32 %s222_s11, 4  ;;  %s21_s10 = int_to_ptr.vmem [resolvable:$true] %s20_s10  ;;  %s35_s12 = int_to_ptr.vmem [resolvable:$true] %s34_s12 }
   0x4   :  { %s163_s13 = scalar_lea.vmem %s21_s10, 256  ;;  %p168_p1 = scmp.lt.s32.totalorder %s21_s10, %s21_s10 }
   0x5   :  { %p164_p0 = scmp.ne.s32.totalorder %s21_s10, %s163_s13  ;;  %p169_p2 = scmp.lt.s32.totalorder %s163_s13, %s163_s13 }
   0x7   :  { %p170_p3 = por %p169_p2, %p168_p1 }
   0x9   :  { %p171_p4 = pnand %p170_p3, %p164_p0 }
   0xb   :  { %174 = shalt.err (!%p171_p4)
}
   0xc   :  { %23 = dma.hbm_to_vmem [thread:$0]  %s250_s0, 256, %s21_s10, [#allocation3]  }
   0xd   :  { %s183_s16 = scalar_lea.vmem %s35_s12, 256  ;;  %p188_p6 = scmp.lt.s32.totalorder %s35_s12, %s35_s12 }
   0xe   :  { %p184_p5 = scmp.ne.s32.totalorder %s35_s12, %s183_s16  ;;  %p189_p7 = scmp.lt.s32.totalorder %s183_s16, %s183_s16 }
  0x10   :  { %p190_p8 = por %p189_p7, %p188_p6 }
  0x12   :  { %p191_p9 = pnand %p190_p8, %p184_p5 }
  0x14   :  { %194 = shalt.err (!%p191_p9)
}
  0x15   :  { %37 = dma.hbm_to_vmem [thread:$0]  %s251_s1, 256, %s35_s12, [#allocation6]  }
  0x16   :  { %215 = dma.done.wait [#allocation3], 256  }
  0x17   :  { %216 = vsyncadd [#allocation3], 4294967040 }
  0x18   :  { %217 = dma.done.wait [#allocation6], 256  }
  0x19   :  { %218 = vsyncadd [#allocation6], 4294967040  ;;  %v223_v0 = vmov 0.0   ;;  %v54_v1 = vld [vmem:[#allocation2] sm:$0xff]  ;;  %v55_v2 = vld [vmem:[#allocation2 + $0x8] sm:$0xff]  ;;  %vm69_vm0 = vcmask 1043456   ;;  %v107_v25 = vlaneseq }
  0x1a   :  { %50 = vst [vmem:[#allocation7] sm:$0xff] %v223_v0  ;;  %51 = vst [vmem:[#allocation7 + $0x8] sm:$0xff] %v223_v0  ;;  %v56_v3 = vld [vmem:[#allocation5] sm:$0xff]  ;;  %v57_v4 = vld [vmem:[#allocation5 + $0x8] sm:$0xff]  ;;  %v224_v23 = vmov 1966171168  }
  0x1b   :  { %52 = vst [vmem:[#allocation7 + $0x10] sm:$0xff] %v223_v0  ;;  %53 = vst [vmem:[#allocation7 + $0x18] sm:$0xff] %v223_v0  ;;  %v58_v5 = vsub.f32 %v54_v1, %v56_v3  ;;  %v59_v6 = vsub.f32 %v55_v2, %v57_v4  ;;  %v105_v24 = vunpack.c.l.s4 %v224_v23  ;;  %v108_v35 = vshrl.u32 %v107_v25, 7  ;;  %s225_s0 = smov [#allocation7]  }
  0x1c   :  { %s140_s1 = sshll.u32 %s225_s0, 4  ;;  %vm130_vm1 = vcmp.lt.s32.totalorder %v107_v25, 512  ;;  %s141_s1 = int_to_ptr.vmem [resolvable:$true] %s140_s1 }
  0x1d   :  { %v60_v7 = vand.u32 2147483647, %v58_v5  ;;  %v61_v8 = vand.u32 2147483647, %v59_v6  ;;  %v106_v34 = vunpack.c.0.s8 %v105_v24  ;;  %s195_s19 = scalar_lea.vmem %s141_s1, 512  ;;  %p200_p11 = scmp.lt.s32.totalorder %s141_s1, %s141_s1 }
  0x1e   :  { %p196_p10 = scmp.ne.s32.totalorder %s141_s1, %s195_s19  ;;  %p201_p12 = scmp.lt.s32.totalorder %s195_s19, %s195_s19 }
  0x1f   :  { %v65_v9 = vcombine.high %v60_v7, %v60_v7  ;;  %v70_v10 = vsel %vm69_vm0, %v60_v7, 0.0  ;;  %v66_v11 = vcombine.high %v61_v8, %v61_v8  ;;  %v84_v13 = vsel %vm69_vm0, %v61_v8, 0.0 }
  0x20   :  { %v71_v12 = vrot.slane %v70_v10, 4  ;;  %v85_v15 = vrot.slane %v84_v13, 4  ;;  %v109_v43 = vsub.s32 %v106_v34, %v108_v35  ;;  %p202_p13 = por %p201_p12, %p200_p11 }
  0x21   :  { %v77_v14 = vsel %vm69_vm0, %v65_v9, 0.0  ;;  %v91_v18 = vsel %vm69_vm0, %v66_v11, 0.0 }
  0x22   :  { %v72_v16 = vadd.f32 %v71_v12, %v70_v10  ;;  %v78_v17 = vrot.slane %v77_v14, 4  ;;  %v86_v19 = vadd.f32 %v85_v15, %v84_v13  ;;  %v92_v20 = vrot.slane %v91_v18, 4  ;;  %v62_v50 = vld [vmem:[#allocation7] ss:$8 sm:$0xf]  ;;  %p203_p0 = pnand %p202_p13, %p196_p10 }
  0x24   :  { %v73_v21 = vrot.slane %v72_v16, 2  ;;  %v79_v22 = vadd.f32 %v78_v17, %v77_v14  ;;  %v87_v26 = vrot.slane %v86_v19, 2  ;;  %v93_v27 = vadd.f32 %v92_v20, %v91_v18 }
  0x26   :  { %v74_v28 = vadd.f32 %v73_v21, %v72_v16  ;;  %v80_v29 = vrot.slane %v79_v22, 2  ;;  %v88_v30 = vadd.f32 %v87_v26, %v86_v19  ;;  %v94_v31 = vrot.slane %v93_v27, 2 }
  0x28   :  { %v75_v32 = vrot.slane %v74_v28, 1  ;;  %v81_v33 = vadd.f32 %v80_v29, %v79_v22  ;;  %v89_v36 = vrot.slane %v88_v30, 1  ;;  %v95_v37 = vadd.f32 %v94_v31, %v93_v27 }
  0x2a   :  { %v76_v38 = vadd.f32 %v75_v32, %v74_v28  ;;  %v82_v39 = vrot.slane %v81_v33, 1  ;;  %v90_v40 = vadd.f32 %v89_v36, %v88_v30  ;;  %v96_v41 = vrot.slane %v95_v37, 1 }
  0x2c   :  { %v83_v42 = vadd.f32 %v82_v39, %v81_v33  ;;  %v97_v44 = vadd.f32 %v96_v41, %v95_v37 }
  0x2e   :  { %v102_v45 = vcombine.low %v76_v38, %v83_v42  ;;  %v103_v46 = vcombine.low %v90_v40, %v97_v44 }
  0x30   :  { %v110_v47 = vrot.slane %v102_v45, %v109_v43  ;;  %v117_v48 = vrot.slane %v103_v46, %v109_v43 }
  0x32   :  { %v118_v49 = vcombine.low %v110_v47, %v117_v48 }
  0x34   :  { %v125_v51 = vrot.slane %v118_v49, %v109_v43 }
  0x36   :  { %v127_v52 = vadd.f32 %v125_v51, %v62_v50 }
  0x38   :  { %132 = vst.msk [vmem:[#allocation7] ss:$8 sm:$0xf] %vm130_vm1, %v127_v52 }
  0x39   :  { %206 = shalt.err (!%p203_p0)
}
  0x3a   :  { %143 = dma.vmem_to_hbm [thread:$0]  %s141_s1, 512, %s252_s2, [#allocation4]  }
  0x3b   :  { %219 = dma.done.wait [#allocation4], 512  }
  0x3c   :  { %220 = vsyncadd [#allocation4], 4294966784 }
  0x3d   :  { %147 = vsyncpa [#allocation3], 1 }
  0x3e   :  { %148 = vsyncpa [#allocation6], 1 }
  0x3f   :  { %149 = vsyncpa [#allocation4], 1 }

</bundles_post_ra>
